<compile_context>
chip_gen: v7x
topology: tpu7x:2x2x1
jax: 0.10.0
libtpu: 0.0.40
codegen_flags: <defaults>
</compile_context>

<pallas_src>
import functools

import jax
import jax.numpy as jnp
from jax import lax
from jax.experimental import pallas as pl
from jax.experimental.pallas import tpu as pltpu


def _mlp_kernel(x_ref, p_ref, o_ref):
    # Packed parameters (f32), VMEM-resident across all grid steps.
    p = p_ref[...]                                    # (16, 11)
    w1 = p[0:10, 0:4].astype(jnp.bfloat16)            # (10, 4)
    b1 = p[0:10, 4:5]                                 # (10, 1)
    w2 = p[10:15, 0:10].astype(jnp.bfloat16)          # (5, 10)
    b2 = p[10:15, 10:11]                              # (5, 1)
    w3c = p[0:5, 5:6]                                 # (5, 1)  (w3 stored as a column)
    b3 = p[5:6, 5:6]                                  # (1, 1)

    x = x_ref[...].astype(jnp.bfloat16)               # (tb, 4), batch on sublanes

    # Layer 1 (MXU): h1 = relu(W1 @ x^T + b1) -> (10, tb); contracting the last
    # axis of both operands moves batch onto the 128-wide lane axis in-kernel.
    dn = (((1,), (1,)), ((), ()))
    h1 = lax.dot_general(w1, x, dn, preferred_element_type=jnp.float32)
    h1 = jnp.maximum(h1 + b1, 0.0)                    # (10, tb) f32

    # Layer 2 (MXU): h2 = relu(W2 @ h1 + b2) -> (5, tb)
    h2 = jnp.dot(w2, h1.astype(jnp.bfloat16), preferred_element_type=jnp.float32)
    h2 = jnp.maximum(h2 + b2, 0.0)                    # (5, tb) f32

    # Output layer (VPU/XLU): a 1x5 matmul isn't worth another MXU weight
    # latch; z = sum_j w3[j] * h2[j, :] + b3.
    z = jnp.sum(w3c * h2, axis=0, keepdims=True) + b3  # (1, tb) f32

    # sigmoid = 1 / (1 + exp(-z)); exp and (approx) reciprocal both on the EUP.
    o_ref[...] = pl.reciprocal(1.0 + jnp.exp(-z), approx=True)


def _pack_params(params):
    """Pack all weights/biases (torch [out, in] layout, 1-D biases) into one
    (16, 11) f32 tile so the kernel has a single VMEM-resident parameter input."""
    w1, b1 = params["w1"], params["b1"]    # (10, 4), (10,)
    w2, b2 = params["w2"], params["b2"]    # (5, 10), (5,)
    w3, b3 = params["w3"], params["b3"]    # (1, 5),  (1,)
    p = jnp.zeros((16, 11), jnp.float32)
    p = p.at[0:10, 0:4].set(w1).at[0:10, 4].set(b1)
    p = p.at[10:15, 0:10].set(w2).at[10:15, 10].set(b2)
    p = p.at[0:5, 5].set(w3[0]).at[5, 5].set(b3[0])   # w3 as a column, b3 below it
    return p


@functools.partial(jax.jit, static_argnames=("tb_max",))
def iris_bcf_forward(x, params, *, tb_max=8192):
    """x: [B, 4] float.  params: torch-layout weights, 1-D biases.  Returns [B, 1] f32."""
    B = x.shape[0]
    x = x.astype(jnp.float32)

    # Lane-aligned batch tile (explicit multiple of 128).  Prefer tile sizes
    # giving >= 2 grid steps (so "parallel" shards across v7x's two
    # TensorCores) while otherwise using the largest tile up to tb_max to
    # amortize the fixed per-step overhead.
    tb_max = max(128, (tb_max // 128) * 128)
    tb = min(tb_max, max(128, pl.cdiv(pl.cdiv(B, 2), 128) * 128))
    Bp = pl.cdiv(B, tb) * tb

    if Bp != B:  # pad along batch only; no transpose / extra HBM pass
        x = jnp.pad(x, ((0, Bp - B), (0, 0)))

    packed = _pack_params(params)

    out = pl.pallas_call(
        _mlp_kernel,
        out_shape=jax.ShapeDtypeStruct((1, Bp), jnp.float32),
        grid=(Bp // tb,),
        in_specs=[
            pl.BlockSpec((tb, 4), lambda i: (i, 0)),    # x tile, pipelined
            pl.BlockSpec((16, 11), lambda i: (0, 0)),   # packed params, resident
        ],
        out_specs=pl.BlockSpec((1, tb), lambda i: (0, i)),  # lane-dense store
        compiler_params=pltpu.CompilerParams(
            dimension_semantics=("parallel",)),         # megacore sharding (v7x)
    )(x, packed)

    # Back to the PyTorch [B, 1] layout, dropping batch padding.  (Consumers
    # that can accept (1, B) directly avoid this small reslice.)
    return out[0, :B].reshape(B, 1)


def init_params(key):
    """PyTorch-default-style init: U(-1/sqrt(fan_in), 1/sqrt(fan_in)).
    Weights in torch [out, in] layout, biases as 1-D vectors."""
    def linear(k, fan_in, fan_out):
        kw, kb = jax.random.split(k)
        bound = 1.0 / jnp.sqrt(float(fan_in))
        w = jax.random.uniform(kw, (fan_out, fan_in), jnp.float32, -bound, bound)
        b = jax.random.uniform(kb, (fan_out,), jnp.float32, -bound, bound)
        return w, b

    k1, k2, k3 = jax.random.split(key, 3)
    w1, b1 = linear(k1, 4, 10)
    w2, b2 = linear(k2, 10, 5)
    w3, b3 = linear(k3, 5, 1)
    return {"w1": w1, "b1": b1, "w2": w2, "b2": b2, "w3": w3, "b3": b3}


def _reference(x, p):
    h1 = jnp.maximum(x @ p["w1"].T + p["b1"], 0.0)
    h2 = jnp.maximum(h1 @ p["w2"].T + p["b2"], 0.0)
    return jax.nn.sigmoid(h2 @ p["w3"].T + p["b3"])


if __name__ == "__main__":
    key = jax.random.PRNGKey(0)
    k_params, k_x1, k_x2 = jax.random.split(key, 3)

    params = init_params(k_params)

    # Small batch consistent with the module (4 iris features).
    x = jax.random.normal(k_x1, (8, 4), jnp.float32)
    out = jax.block_until_ready(iris_bcf_forward(x, params))
    ref = _reference(x, params)
    assert out.shape == (8, 1)
    # bf16 matmul operands + approx reciprocal -> loosened tolerance.
    assert jnp.allclose(out, ref, atol=2e-2, rtol=2e-2), float(jnp.max(jnp.abs(out - ref)))

    # Batch that is neither a lane multiple nor <=128: exercises the padding
    # path and a multi-step ("parallel") grid.
    x2 = jax.random.normal(k_x2, (200, 4), jnp.float32)
    out2 = jax.block_until_ready(iris_bcf_forward(x2, params))
    ref2 = _reference(x2, params)
    assert out2.shape == (200, 1)
    assert jnp.allclose(out2, ref2, atol=2e-2, rtol=2e-2), float(jnp.max(jnp.abs(out2 - ref2)))

    print("KERNEL_OK")
</pallas_src>

<mosaic_0001>
module attributes {stable_mosaic.version = 11 : i64} {
  func.func @_mlp_kernel(%arg0: i32, %arg1: memref<128x4xf32, #tpu.memory_space<vmem>>, %arg2: memref<16x11xf32, #tpu.memory_space<vmem>>, %arg3: memref<1x128xf32, #tpu.memory_space<vmem>>) attributes {dimension_semantics = [#tpu.dimension_semantics<parallel>], iteration_bounds = array<i64: 1>, scalar_prefetch = 0 : i64, scratch_operands = 0 : i64, tpu.core_type = #tpu.core_type<tc>, window_params = [{transform_indices = @transform_0, window_bounds = array<i64: 128, 4>}, {pipeline_mode = #tpu.pipeline_mode<synchronous>, transform_indices = @transform_1, window_bounds = array<i64: 16, 11>}, {transform_indices = @transform_2, window_bounds = array<i64: 1, 128>}]} {
    %c0 = arith.constant 0 : index
    %c0_0 = arith.constant 0 : index
    %0 = vector.load %arg2[%c0, %c0_0] : memref<16x11xf32, #tpu.memory_space<vmem>>, vector<16x11xf32>
    %1 = vector.extract_strided_slice %0 {offsets = [0, 0], sizes = [10, 4], strides = [1, 1]} : vector<16x11xf32> to vector<10x4xf32>
    %2 = arith.truncf %1 : vector<10x4xf32> to vector<10x4xbf16>
    %3 = vector.extract_strided_slice %0 {offsets = [0, 4], sizes = [10, 1], strides = [1, 1]} : vector<16x11xf32> to vector<10x1xf32>
    %4 = vector.extract_strided_slice %0 {offsets = [10, 0], sizes = [5, 10], strides = [1, 1]} : vector<16x11xf32> to vector<5x10xf32>
    %5 = arith.truncf %4 : vector<5x10xf32> to vector<5x10xbf16>
    %6 = vector.extract_strided_slice %0 {offsets = [10, 10], sizes = [5, 1], strides = [1, 1]} : vector<16x11xf32> to vector<5x1xf32>
    %7 = vector.extract_strided_slice %0 {offsets = [0, 5], sizes = [5, 1], strides = [1, 1]} : vector<16x11xf32> to vector<5x1xf32>
    %8 = vector.extract_strided_slice %0 {offsets = [5, 5], sizes = [1, 1], strides = [1, 1]} : vector<16x11xf32> to vector<1x1xf32>
    %c0_1 = arith.constant 0 : index
    %c0_2 = arith.constant 0 : index
    %9 = vector.load %arg1[%c0_1, %c0_2] : memref<128x4xf32, #tpu.memory_space<vmem>>, vector<128x4xf32>
    %10 = arith.truncf %9 : vector<128x4xf32> to vector<128x4xbf16>
    %cst = arith.constant dense<0.000000e+00> : vector<10x128xf32>
    %11 = tpu.matmul %2, %10, %cst {dimension_numbers = #tpu.dot_dimension_numbers<[1], [1], [0], [0], [0, 0, 1, 0], [], []>} : vector<10x4xbf16>, vector<128x4xbf16>, vector<10x128xf32> -> vector<10x128xf32>
    %12 = vector.broadcast %3 : vector<10x1xf32> to vector<10x128xf32>
    %13 = arith.addf %11, %12 : vector<10x128xf32>
    %cst_3 = arith.constant 0.000000e+00 : f32
    %14 = vector.broadcast %cst_3 : f32 to vector<10x128xf32>
    %15 = arith.maximumf %13, %14 : vector<10x128xf32>
    %16 = arith.truncf %15 : vector<10x128xf32> to vector<10x128xbf16>
    %cst_4 = arith.constant dense<0.000000e+00> : vector<5x128xf32>
    %17 = tpu.matmul %5, %16, %cst_4 {dimension_numbers = #tpu.dot_dimension_numbers<[1], [0], [0], [1], [0, 0, 1, 1], [], []>} : vector<5x10xbf16>, vector<10x128xbf16>, vector<5x128xf32> -> vector<5x128xf32>
    %18 = vector.broadcast %6 : vector<5x1xf32> to vector<5x128xf32>
    %19 = arith.addf %17, %18 : vector<5x128xf32>
    %cst_5 = arith.constant 0.000000e+00 : f32
    %20 = vector.broadcast %cst_5 : f32 to vector<5x128xf32>
    %21 = arith.maximumf %19, %20 : vector<5x128xf32>
    %22 = vector.broadcast %7 : vector<5x1xf32> to vector<5x128xf32>
    %23 = arith.mulf %22, %21 : vector<5x128xf32>
    %cst_6 = arith.constant dense<0.000000e+00> : vector<128xf32>
    %24 = vector.multi_reduction <add>, %23, %cst_6 [0] : vector<5x128xf32> to vector<128xf32>
    %25 = vector.shape_cast %24 : vector<128xf32> to vector<1x128xf32>
    %26 = vector.broadcast %8 : vector<1x1xf32> to vector<1x128xf32>
    %27 = arith.addf %25, %26 : vector<1x128xf32>
    %cst_7 = arith.constant 0.000000e+00 : f32
    %28 = vector.broadcast %cst_7 : f32 to vector<1x128xf32>
    %29 = arith.subf %28, %27 : vector<1x128xf32>
    %30 = math.exp %29 : vector<1x128xf32>
    %cst_8 = arith.constant 1.000000e+00 : f32
    %31 = vector.broadcast %cst_8 : f32 to vector<1x128xf32>
    %32 = arith.addf %31, %30 : vector<1x128xf32>
    %33 = tpu.reciprocal %32 {approx = true} : vector<1x128xf32> -> vector<1x128xf32>
    %c0_9 = arith.constant 0 : index
    %c0_10 = arith.constant 0 : index
    %34 = vector.load %arg3[%c0_9, %c0_10] : memref<1x128xf32, #tpu.memory_space<vmem>>, vector<1x128xf32>
    tpu.vector_store %arg3[%c0_9, %c0_10], %33 {strides = array<i32>} : memref<1x128xf32, #tpu.memory_space<vmem>>, vector<1x128xf32>,
    return
  }
  func.func @transform_0(%arg0: i32) -> (i32, i32) {
    %c0_i32 = arith.constant 0 : i32
    %c0_i32_0 = arith.constant 0 : i32
    return %arg0, %c0_i32 : i32, i32
  }
  func.func @transform_1(%arg0: i32) -> (i32, i32) {
    %c0_i32 = arith.constant 0 : i32
    %c0_i32_0 = arith.constant 0 : i32
    %c0_i32_1 = arith.constant 0 : i32
    return %c0_i32, %c0_i32_0 : i32, i32
  }
  func.func @transform_2(%arg0: i32) -> (i32, i32) {
    %c0_i32 = arith.constant 0 : i32
    %c0_i32_0 = arith.constant 0 : i32
    return %c0_i32, %arg0 : i32, i32
  }
}

</mosaic_0001>

<bundles_post_ra>
// kernel: iris_bcf_forward.1
= control target key start
LH: loop header
LB: loop body
LE: loop exit
PB: predicated region body
PF: predicated region fallthrough
CT: control target
= control target key end

     0   :  { %v253_v0 = vmov 0.0   ;;  %vm50_vm0 = vcmask 31744   ;;  %vm254_vm1 = vmmov 0   ;;  %v255_v4 = vmov 4   ;;  %s341_s0 = inlined_call_operand.vmem [shape: f32[128,4], index: 0, kind: input, shape index: {}]   ;;  %s342_s1 = inlined_call_operand.vmem [shape: f32[16,11], index: 1, kind: input, shape index: {}]   ;;  %s343_s2 = inlined_call_operand.vmem [shape: f32[1,128], index: 2, kind: output, shape index: {}]  }
   0x1   :  { %214 = vmatprep.subr.bf16.mxu0 %v253_v0  ;;  %v16_v1 = vld [vmem:[%s341_s0] sm:$0xff]  ;;  %v17_v2 = vld [vmem:[%s341_s0 + $0x8] sm:$0xff]  ;;  %230 = vmatprep.mubr.msk.bf16.mxu0 %vm254_vm1, %v253_v0  ;;  %v18_v5 = vld [vmem:[%s341_s0 + $0x10] sm:$0xff]  ;;  %v256_v37 = vmov 10   ;;  %v257_v38 = vmov 5   ;;  %vm133_vm2 = vcmask 1044480  }
   0x2   :  { %v32_v3 = vpack.c.bf16 %v17_v2, %v16_v1  ;;  %245 = vset.pattern.permute.xlu0 %v255_v4  ;;  %234 = vmatprep.subr.bf16.mxu1 %v253_v0  ;;  %v19_v6 = vld [vmem:[%s341_s0 + $0x18] sm:$0xff]  ;;  %v12_v9 = vld [vmem:[%s342_s1] sm:$0xff]  ;;  %v13_v11 = vld [vmem:[%s342_s1 + $0x8] sm:$0xff]  ;;  %vm129_vm3 = vcmask 80896  }
   0x3   :  { %236 = vmatprep.mubr.msk.bf16.mxu1 %vm254_vm1, %v253_v0  ;;  %v33_v8 = vpack.c.bf16 %v19_v6, %v18_v5  ;;  %42 = vperm.xlu0 %245, %v12_v9   ;;  %v20_v12 = vld [vmem:[%s341_s0 + $0x20] sm:$0xff]  ;;  %v21_v13 = vld [vmem:[%s341_s0 + $0x28] sm:$0xff]  ;;  %v22_v16 = vld [vmem:[%s341_s0 + $0x30] sm:$0xff]  ;;  %v14_v36 = vpack.c.bf16 %v13_v11, %v12_v9  ;;  %v15_v49 = vpack.c.bf16 %v13_v11, %v13_v11 }
   0x4   :  { %v55_v7 = vsel %vm50_vm0, %v32_v3, 0  ;;  %v34_v14 = vpack.c.bf16 %v21_v13, %v20_v12  ;;  %v23_v17 = vld [vmem:[%s341_s0 + $0x38] sm:$0xff]  ;;  %v24_v20 = vld [vmem:[%s341_s0 + $0x40] sm:$0xff]  ;;  %v25_v21 = vld [vmem:[%s341_s0 + $0x48] sm:$0xff]  ;;  %246 = vset.pattern.permute.xlu1 %v256_v37 }
   0x5   :  { %215 = vmatpush3.bf16.xpose.msra.mxu0 %v55_v7  ;;  %v58_v10 = vsel %vm50_vm0, %v33_v8, 0  ;;  %v35_v18 = vpack.c.bf16 %v23_v17, %v22_v16  ;;  %v36_v22 = vpack.c.bf16 %v25_v21, %v24_v20  ;;  %v26_v24 = vld [vmem:[%s341_s0 + $0x50] sm:$0xff]  ;;  %v27_v25 = vld [vmem:[%s341_s0 + $0x58] sm:$0xff]  ;;  %v28_v28 = vld [vmem:[%s341_s0 + $0x60] sm:$0xff]  ;;  %123 = vperm.xlu1 %246, %v13_v11   ;;  %v126_v52 = vrot.slane %v15_v49, 1 }
   0x6   :  { %216 = vmatprep.subr.bf16.mxu0 %v253_v0  ;;  %v61_v15 = vsel %vm50_vm0, %v34_v14, 0  ;;  %v37_v26 = vpack.c.bf16 %v27_v25, %v26_v24  ;;  %v29_v29 = vld [vmem:[%s341_s0 + $0x68] sm:$0xff]  ;;  %v30_v32 = vld [vmem:[%s341_s0 + $0x70] sm:$0xff]  ;;  %v31_v33 = vld [vmem:[%s341_s0 + $0x78] sm:$0xff] }
   0x7   :  { %47 = vperm.xlu0 %245, %v13_v11   ;;  %v64_v19 = vsel %vm50_vm0, %v35_v18, 0  ;;  %v67_v23 = vsel %vm50_vm0, %v36_v22, 0  ;;  %v38_v30 = vpack.c.bf16 %v29_v29, %v28_v28  ;;  %v39_v34 = vpack.c.bf16 %v31_v33, %v30_v32 }
   0x8   :  { %v70_v27 = vsel %vm50_vm0, %v37_v26, 0 }
   0x9   :  { %v73_v31 = vsel %vm50_vm0, %v38_v30, 0  ;;  %v76_v35 = vsel %vm50_vm0, %v39_v34, 0  ;;  %247 = vset.pattern.permute.xlu1 %v257_v38 }
   0xa   :  { %179 = vperm.xlu1 %247, %v12_v9  }
   0xb   :  { %248 = vset.pattern.permute.xlu0 %v257_v38 }
   0xd   :  { %217 = vmatpush3.bf16.xpose.msra.mxu0 %v58_v10 }
   0xe   :  { %218 = vmatprep.subr.bf16.mxu0 %v253_v0 }
  0x15   :  { %219 = vmatpush3.bf16.xpose.msra.mxu0 %v61_v15 }
  0x16   :  { %220 = vmatprep.subr.bf16.mxu0 %v253_v0 }
  0x1d   :  { %221 = vmatpush3.bf16.xpose.msra.mxu0 %v64_v19 }
  0x1e   :  { %222 = vmatprep.subr.bf16.mxu0 %v253_v0 }
  0x25   :  { %223 = vmatpush3.bf16.xpose.msra.mxu0 %v67_v23 }
  0x26   :  { %224 = vmatprep.subr.bf16.mxu0 %v253_v0 }
  0x2d   :  { %225 = vmatpush3.bf16.xpose.msra.mxu0 %v70_v27 }
  0x2e   :  { %226 = vmatprep.subr.bf16.mxu0 %v253_v0 }
  0x35   :  { %227 = vmatpush3.bf16.xpose.msra.mxu0 %v73_v31 }
  0x36   :  { %228 = vmatprep.subr.bf16.mxu0 %v253_v0 }
  0x3d   :  { %229 = vmatpush3.bf16.xpose.msra.mxu0 %v76_v35 }
  0x44   :  { %231 = vmatmul.mubr.msk.bf16.vlgmr.msra.gmra.mrb[0].mxu0 %vm50_vm0, %v14_v36 }
  0x82   :  { %v43_v39 = vpop.permute.xlu0 %42 }
  0x84   :  { %v124_v53 = vpop.permute.xlu1 %123 }
  0x85   :  { %v127_v54 = vrot.slane %v124_v53, 2 }
  0x86   :  { %v48_v43 = vpop.permute.xlu0 %47 }
  0x89   :  { %v180_v59 = vpop.permute.xlu1 %179 }
 0x117   :  { %v112_v40 = vpop.f32.mrb[0].mxu0 }
 0x118   :  { %v113_v41 = vadd.f32 %v112_v40, %v43_v39  ;;  %v232_v42 = vpop.f32.mrb[1].mxu0 }
 0x119   :  { %v115_v44 = vpop.f32.mrb[2].mxu0 }
 0x11a   :  { %v116_v45 = vadd.f32 %v115_v44, %v48_v43  ;;  %v233_v46 = vpop.f32.mrb[3].mxu0  ;;  %v119_v47 = vmax.f32 %v113_v41, 0.0 }
 0x11c   :  { %v120_v48 = vmax.f32 %v116_v45, 0.0 }
 0x11e   :  { %v121_v50 = vpack.c.bf16 %v120_v48, %v119_v47 }
 0x120   :  { %v135_v51 = vsel %vm133_vm2, %v121_v50, 0 }
 0x121   :  { %235 = vmatpush3.bf16.msra.mxu1 %v135_v51 }
 0x124   :  { %237 = vmatmul.mubr.msk.bf16.vlgmr.msra.gmra.mrb[0].mxu1 %vm129_vm3, %v126_v52 }
 0x1f7   :  { %v171_v55 = vpop.f32.mrb[0].mxu1 }
 0x1f8   :  { %v172_v56 = vadd.f32 %v171_v55, %v127_v54  ;;  %v238_v57 = vpop.f32.mrb[1].mxu1 }
 0x1f9   :  { %v174_v58 = vpop.f32.mrb[2].mxu1 }
 0x1fa   :  { %v177_v60 = vmax.f32 %v172_v56, 0.0  ;;  %v239_v61 = vpop.f32.mrb[3].mxu1 }
 0x1fc   :  { %v182_v62 = vmul.f32 %v180_v59, %v177_v60 }
 0x1fe   :  { %v183_v63 = vsel %vm133_vm2, %v182_v62, 0.0 }
 0x1ff   :  { %v184_v0 = vrot.slane %v183_v63, 4 }
 0x201   :  { %v185_v1 = vadd.f32 %v184_v0, %v183_v63 }
 0x203   :  { %v186_v2 = vrot.slane %v185_v1, 2 }
 0x205   :  { %v187_v3 = vadd.f32 %v186_v2, %v185_v1 }
 0x207   :  { %v188_v4 = vrot.slane %v187_v3, 1 }
 0x209   :  { %v189_v5 = vadd.f32 %v188_v4, %v187_v3 }
 0x20b   :  { %v190_v6 = vadd.f32 %v189_v5, %v180_v59 }
 0x20d   :  { %v191_v7 = vsub.f32 0.0, %v190_v6 }
 0x20f   :  { %v192_v8 = vmul.f32 1.442695, %v191_v7 }
 0x211   :  { %249 = vpow2.f32 %v192_v8 }
 0x21b   :  { %v250_v9 = vpop.eup %249 }
 0x21c   :  { %v194_v10 = vadd.f32 1.0, %v250_v9 }
 0x21e   :  { %251 = vrcp.f32 %v194_v10 }
 0x228   :  { %v252_v11 = vpop.eup %251 }
 0x229   :  { %196 = vst [vmem:[%s343_s2 - $0x5] sm:$0x20] %v252_v11 }

</bundles_post_ra>
